<compile_context>
chip_gen: v5e
topology: v5e:2x2
jax: 0.10.0
libtpu: 0.0.40
codegen_flags: <defaults>
</compile_context>

<pallas_src>
import functools

import jax
import jax.numpy as jnp
from jax.experimental import pallas as pl
from jax.experimental.pallas import tpu as pltpu

# Synthetic CFG_DICT['DATASET'] sizes (deterministic, in-script).
NUM_SEX = 2
NUM_AGES = 7
NUM_OCCUPS = 21
NUM_ZIPS = 10
EMB_SIZE = 32  # rep_dim = 4 * EMB_SIZE = 128


def _round_up(x, m):
    return ((x + m - 1) // m) * m


def _user_rep_kernel(feat_ref, tab_ref, out_ref, *, vocabs, offsets):
    """One grid step = TB batch rows.

    feat_ref : VMEM (TB, 4) float32   -- raw id features data[:, 0, 1:5]
    tab_ref  : VMEM (V_pad, 4*E) f32  -- combined lane-offset-packed tables
    out_ref  : VMEM (TB, 4*E)         -- output block for these TB rows
    """
    tb = feat_ref.shape[0]
    v_pad = tab_ref.shape[0]

    # Index prep fused in-kernel (VPU): f32 -> i32 truncation, bounds clamp
    # (nn.Embedding would raise on OOB ids; we clamp -- only diverges on
    # invalid inputs), then shift into the packed table's vocab range.
    raw = feat_ref[...].astype(jnp.int32)                        # (TB, 4)
    iota = jax.lax.broadcasted_iota(jnp.int32, (tb, v_pad), 1)   # (TB, V_pad)

    # Boolean one-hot with 4 ones per row (the four features live in disjoint
    # sublane ranges of the packed table): integer compares + OR, single cast.
    hit = None
    for f in range(4):
        col = jnp.clip(raw[:, f:f + 1], 0, vocabs[f] - 1) + offsets[f]
        m = iota == col
        hit = m if hit is None else hit | m
    onehot = hit.astype(jnp.bfloat16)                            # exact 0/1

    # Exact 3-pass bf16 decomposition of the f32 table: hi+mid+lo covers the
    # full 24-bit mantissa; the one-hot is exact in bf16 and each output
    # element gets exactly one nonzero product, so the sum matches the f32
    # gather reference.  Split runs on a tiny (V_pad, 4E) tile -- negligible.
    tab = tab_ref[...]
    tab_hi = tab.astype(jnp.bfloat16)
    r1 = tab - tab_hi.astype(jnp.float32)
    tab_mid = r1.astype(jnp.bfloat16)
    tab_lo = (r1 - tab_mid.astype(jnp.float32)).astype(jnp.bfloat16)

    acc = jnp.dot(onehot, tab_hi, preferred_element_type=jnp.float32)
    acc = acc + jnp.dot(onehot, tab_mid, preferred_element_type=jnp.float32)
    acc = acc + jnp.dot(onehot, tab_lo, preferred_element_type=jnp.float32)
    out_ref[...] = acc.astype(out_ref.dtype)


def user_rep_forward(data, gender_tab, age_tab, occup_tab, zip_tab):
    """Pallas implementation of InitialRecommenderUserRep.forward."""
    B = data.shape[0]
    E = gender_tab.shape[1]
    out_dim = 4 * E

    tables = (gender_tab, age_tab, occup_tab, zip_tab)
    vocabs = tuple(int(t.shape[0]) for t in tables)
    offsets = (0,
               vocabs[0],
               vocabs[0] + vocabs[1],
               vocabs[0] + vocabs[1] + vocabs[2])
    v_pad = max(_round_up(sum(vocabs), 8), 8)

    # Pack the four tables once into a single (V_pad, 4*E) table: feature f's
    # rows sit at sublane offset offsets[f], its embedding in lanes
    # [f*E, (f+1)*E), so the concat falls out of the matmul's lane packing.
    combined = jnp.zeros((v_pad, out_dim), gender_tab.dtype)
    for f, tab in enumerate(tables):
        combined = combined.at[offsets[f]:offsets[f] + vocabs[f],
                               f * E:(f + 1) * E].set(tab)

    # Raw feature slice stays f32; cast/clip/offset happen inside the kernel.
    feats = data[:, 0, 1:5]                                      # (B, 4) f32

    # Batch tiling: large (<=2048-row) tiles amortize the ~0.35us/step
    # pipeline overhead (kernel is HBM/overhead bound); keep >=2 grid steps
    # once B > 16 so the 'parallel' axis can shard across v7x's two cores.
    if B <= 16:
        tb = max(8, _round_up(B, 8))
    else:
        tb = min(2048, _round_up((B + 1) // 2, 8))
    b_pad = _round_up(B, tb)
    if b_pad != B:
        # Padded rows produce throwaway values; sliced off below.
        feats = jnp.pad(feats, ((0, b_pad - B), (0, 0)))

    kernel = functools.partial(_user_rep_kernel, vocabs=vocabs, offsets=offsets)

    grid_spec = pltpu.PrefetchScalarGridSpec(
        num_scalar_prefetch=0,
        grid=(b_pad // tb,),
        in_specs=[
            pl.BlockSpec((tb, 4), lambda i: (i, 0)),            # feature block
            pl.BlockSpec((v_pad, out_dim), lambda i: (0, 0)),   # table (resident)
        ],
        out_specs=pl.BlockSpec((tb, out_dim), lambda i: (i, 0)),
    )

    out = pl.pallas_call(
        kernel,
        grid_spec=grid_spec,
        out_shape=jax.ShapeDtypeStruct((b_pad, out_dim), gender_tab.dtype),
        compiler_params=pltpu.CompilerParams(
            dimension_semantics=("parallel",),
            vmem_limit_bytes=32 * 1024 * 1024),
    )(feats, combined)
    return out[:B]


def _reference(data, gender_tab, age_tab, occup_tab, zip_tab):
    idx = data[:, 0, 1:5].astype(jnp.int32)
    return jnp.concatenate(
        [jnp.take(gender_tab, idx[:, 0], axis=0),
         jnp.take(age_tab,    idx[:, 1], axis=0),
         jnp.take(occup_tab,  idx[:, 2], axis=0),
         jnp.take(zip_tab,    idx[:, 3], axis=0)],
        axis=1,
    )


if __name__ == "__main__":
    key = jax.random.PRNGKey(0)
    k_g, k_a, k_o, k_z, k_d, k_i = jax.random.split(key, 6)

    # nn.Embedding default init: N(0, 1)
    gender_tab = jax.random.normal(k_g, (NUM_SEX,    EMB_SIZE), jnp.float32)
    age_tab    = jax.random.normal(k_a, (NUM_AGES,   EMB_SIZE), jnp.float32)
    occup_tab  = jax.random.normal(k_o, (NUM_OCCUPS, EMB_SIZE), jnp.float32)
    zip_tab    = jax.random.normal(k_z, (NUM_ZIPS,   EMB_SIZE), jnp.float32)

    # data: (B, seq, feat) float tensor; features 1..4 hold integer-coded ids.
    B, S, F = 2, 8, 6
    data = jax.random.normal(k_d, (B, S, F), jnp.float32)
    sex = jax.random.randint(k_i, (B,), 0, NUM_SEX)
    age = jax.random.randint(jax.random.fold_in(k_i, 1), (B,), 0, NUM_AGES)
    occ = jax.random.randint(jax.random.fold_in(k_i, 2), (B,), 0, NUM_OCCUPS)
    zp  = jax.random.randint(jax.random.fold_in(k_i, 3), (B,), 0, NUM_ZIPS)
    ids = jnp.stack([sex, age, occ, zp], axis=1).astype(jnp.float32)  # (B, 4)
    data = data.at[:, 0, 1:5].set(ids)

    out = user_rep_forward(data, gender_tab, age_tab, occup_tab, zip_tab)
    out = jax.block_until_ready(out)

    ref = _reference(data, gender_tab, age_tab, occup_tab, zip_tab)
    assert out.shape == (B, 4 * EMB_SIZE), out.shape
    assert jnp.allclose(out, ref, atol=1e-6, rtol=1e-6)

    print("KERNEL_OK")
</pallas_src>

<mosaic_0001>
module attributes {stable_mosaic.version = 11 : i64} {
  func.func @_user_rep_kernel(%arg0: i32, %arg1: memref<8x4xf32, #tpu.memory_space<vmem>>, %arg2: memref<40x128xf32, #tpu.memory_space<vmem>>, %arg3: memref<8x128xf32, #tpu.memory_space<vmem>>) attributes {dimension_semantics = [#tpu.dimension_semantics<parallel>], iteration_bounds = array<i64: 1>, scalar_prefetch = 0 : i64, scratch_operands = 0 : i64, tpu.core_type = #tpu.core_type<tc>, window_params = [{transform_indices = @transform_0, window_bounds = array<i64: 8, 4>}, {pipeline_mode = #tpu.pipeline_mode<synchronous>, transform_indices = @transform_1, window_bounds = array<i64: 40, 128>}, {transform_indices = @transform_2, window_bounds = array<i64: 8, 128>}]} {
    %c0 = arith.constant 0 : index
    %c0_0 = arith.constant 0 : index
    %0 = vector.load %arg1[%c0, %c0_0] : memref<8x4xf32, #tpu.memory_space<vmem>>, vector<8x4xf32>
    %1 = arith.fptosi %0 : vector<8x4xf32> to vector<8x4xi32>
    %2 = tpu.iota {dimensions = array<i32: 1>} : vector<8x40xi32>
    %3 = vector.extract_strided_slice %1 {offsets = [0, 0], sizes = [8, 1], strides = [1, 1]} : vector<8x4xi32> to vector<8x1xi32>
    %c0_i32 = arith.constant 0 : i32
    %c1_i32 = arith.constant 1 : i32
    %4 = vector.broadcast %c0_i32 : i32 to vector<8x1xi32>
    %5 = arith.maxsi %4, %3 : vector<8x1xi32>
    %6 = vector.broadcast %c1_i32 : i32 to vector<8x1xi32>
    %7 = arith.minsi %6, %5 : vector<8x1xi32>
    %c0_i32_1 = arith.constant 0 : i32
    %8 = vector.broadcast %c0_i32_1 : i32 to vector<8x1xi32>
    %9 = arith.addi %7, %8 : vector<8x1xi32>
    %10 = vector.broadcast %9 : vector<8x1xi32> to vector<8x40xi32>
    %11 = arith.cmpi eq, %2, %10 : vector<8x40xi32>
    %12 = vector.extract_strided_slice %1 {offsets = [0, 1], sizes = [8, 1], strides = [1, 1]} : vector<8x4xi32> to vector<8x1xi32>
    %c0_i32_2 = arith.constant 0 : i32
    %c6_i32 = arith.constant 6 : i32
    %13 = vector.broadcast %c0_i32_2 : i32 to vector<8x1xi32>
    %14 = arith.maxsi %13, %12 : vector<8x1xi32>
    %15 = vector.broadcast %c6_i32 : i32 to vector<8x1xi32>
    %16 = arith.minsi %15, %14 : vector<8x1xi32>
    %c2_i32 = arith.constant 2 : i32
    %17 = vector.broadcast %c2_i32 : i32 to vector<8x1xi32>
    %18 = arith.addi %16, %17 : vector<8x1xi32>
    %19 = vector.broadcast %18 : vector<8x1xi32> to vector<8x40xi32>
    %20 = arith.cmpi eq, %2, %19 : vector<8x40xi32>
    %21 = arith.ori %11, %20 : vector<8x40xi1>
    %22 = vector.extract_strided_slice %1 {offsets = [0, 2], sizes = [8, 1], strides = [1, 1]} : vector<8x4xi32> to vector<8x1xi32>
    %c0_i32_3 = arith.constant 0 : i32
    %c20_i32 = arith.constant 20 : i32
    %23 = vector.broadcast %c0_i32_3 : i32 to vector<8x1xi32>
    %24 = arith.maxsi %23, %22 : vector<8x1xi32>
    %25 = vector.broadcast %c20_i32 : i32 to vector<8x1xi32>
    %26 = arith.minsi %25, %24 : vector<8x1xi32>
    %c9_i32 = arith.constant 9 : i32
    %27 = vector.broadcast %c9_i32 : i32 to vector<8x1xi32>
    %28 = arith.addi %26, %27 : vector<8x1xi32>
    %29 = vector.broadcast %28 : vector<8x1xi32> to vector<8x40xi32>
    %30 = arith.cmpi eq, %2, %29 : vector<8x40xi32>
    %31 = arith.ori %21, %30 : vector<8x40xi1>
    %32 = vector.extract_strided_slice %1 {offsets = [0, 3], sizes = [8, 1], strides = [1, 1]} : vector<8x4xi32> to vector<8x1xi32>
    %c0_i32_4 = arith.constant 0 : i32
    %c9_i32_5 = arith.constant 9 : i32
    %33 = vector.broadcast %c0_i32_4 : i32 to vector<8x1xi32>
    %34 = arith.maxsi %33, %32 : vector<8x1xi32>
    %35 = vector.broadcast %c9_i32_5 : i32 to vector<8x1xi32>
    %36 = arith.minsi %35, %34 : vector<8x1xi32>
    %c30_i32 = arith.constant 30 : i32
    %37 = vector.broadcast %c30_i32 : i32 to vector<8x1xi32>
    %38 = arith.addi %36, %37 : vector<8x1xi32>
    %39 = vector.broadcast %38 : vector<8x1xi32> to vector<8x40xi32>
    %40 = arith.cmpi eq, %2, %39 : vector<8x40xi32>
    %41 = arith.ori %31, %40 : vector<8x40xi1>
    %42 = arith.extui %41 : vector<8x40xi1> to vector<8x40xi32>
    %43 = arith.sitofp %42 : vector<8x40xi32> to vector<8x40xf32>
    %44 = arith.truncf %43 : vector<8x40xf32> to vector<8x40xbf16>
    %c0_6 = arith.constant 0 : index
    %c0_7 = arith.constant 0 : index
    %45 = vector.load %arg2[%c0_6, %c0_7] : memref<40x128xf32, #tpu.memory_space<vmem>>, vector<40x128xf32>
    %46 = arith.truncf %45 : vector<40x128xf32> to vector<40x128xbf16>
    %47 = arith.extf %46 : vector<40x128xbf16> to vector<40x128xf32>
    %48 = arith.subf %45, %47 : vector<40x128xf32>
    %49 = arith.truncf %48 : vector<40x128xf32> to vector<40x128xbf16>
    %50 = arith.extf %49 : vector<40x128xbf16> to vector<40x128xf32>
    %51 = arith.subf %48, %50 : vector<40x128xf32>
    %52 = arith.truncf %51 : vector<40x128xf32> to vector<40x128xbf16>
    %cst = arith.constant dense<0.000000e+00> : vector<8x128xf32>
    %53 = tpu.matmul %44, %46, %cst {dimension_numbers = #tpu.dot_dimension_numbers<[1], [0], [0], [1], [0, 0, 1, 1], [], []>} : vector<8x40xbf16>, vector<40x128xbf16>, vector<8x128xf32> -> vector<8x128xf32>
    %cst_8 = arith.constant dense<0.000000e+00> : vector<8x128xf32>
    %54 = tpu.matmul %44, %49, %cst_8 {dimension_numbers = #tpu.dot_dimension_numbers<[1], [0], [0], [1], [0, 0, 1, 1], [], []>} : vector<8x40xbf16>, vector<40x128xbf16>, vector<8x128xf32> -> vector<8x128xf32>
    %55 = arith.addf %53, %54 : vector<8x128xf32>
    %cst_9 = arith.constant dense<0.000000e+00> : vector<8x128xf32>
    %56 = tpu.matmul %44, %52, %cst_9 {dimension_numbers = #tpu.dot_dimension_numbers<[1], [0], [0], [1], [0, 0, 1, 1], [], []>} : vector<8x40xbf16>, vector<40x128xbf16>, vector<8x128xf32> -> vector<8x128xf32>
    %57 = arith.addf %55, %56 : vector<8x128xf32>
    %c0_10 = arith.constant 0 : index
    %c0_11 = arith.constant 0 : index
    %58 = vector.load %arg3[%c0_10, %c0_11] : memref<8x128xf32, #tpu.memory_space<vmem>>, vector<8x128xf32>
    tpu.vector_store %arg3[%c0_10, %c0_11], %57 {strides = array<i32>} : memref<8x128xf32, #tpu.memory_space<vmem>>, vector<8x128xf32>,
    return
  }
  func.func @transform_0(%arg0: i32) -> (i32, i32) {
    %c0_i32 = arith.constant 0 : i32
    %c0_i32_0 = arith.constant 0 : i32
    return %arg0, %c0_i32 : i32, i32
  }
  func.func @transform_1(%arg0: i32) -> (i32, i32) {
    %c0_i32 = arith.constant 0 : i32
    %c0_i32_0 = arith.constant 0 : i32
    %c0_i32_1 = arith.constant 0 : i32
    return %c0_i32, %c0_i32_0 : i32, i32
  }
  func.func @transform_2(%arg0: i32) -> (i32, i32) {
    %c0_i32 = arith.constant 0 : i32
    %c0_i32_0 = arith.constant 0 : i32
    return %arg0, %c0_i32 : i32, i32
  }
}

</mosaic_0001>

<bundles_post_ra>
// kernel: tpu_custom_call.1
= control target key start
LH: loop header
LB: loop body
LE: loop exit
PB: predicated region body
PF: predicated region fallthrough
CT: control target
= control target key end

     0   :  { %7 = vsyncpa [#allocation3], 0  ;;  %s316_s0 = inlined_call_operand.vmem [shape: f32[8,4], index: 0, kind: input, shape index: {}]   ;;  %s317_s1 = inlined_call_operand.hbm [shape: f32[40,128], index: 1, kind: input, shape index: {}]   ;;  %s318_s2 = inlined_call_operand.hbm [shape: f32[8,128], index: 2, kind: output, shape index: {}]  }
   0x1   :  { %8 = vsyncpa [#allocation4], 0  ;;  %s15_s11 = sshll.u32 %s317_s1, 4  ;;  %s283_s12 = smov [#allocation2]   ;;  %s16_s11 = int_to_ptr.hbm [resolvable:$true] %s15_s11 }
   0x2   :  { %s17_s13 = sshll.u32 %s283_s12, 4  ;;  %s284_s14 = smov 128   ;;  %s18_s13 = int_to_ptr.vmem [resolvable:$true] %s17_s13 }
   0x3   :  { %s285_s15 = smov 8  }
   0x4   :  { %23 = dma.hbm_to_vmem [thread:$0]  %s16_s11, 640, %s18_s13, [#allocation3], %s284_s14, %s284_s14, %s285_s15  }
   0x5   :  { %279 = dma.done.wait [#allocation3], 640  }
   0x6   :  { %280 = vsyncadd [#allocation3], 4294966656  ;;  %v286_v0 = vmov 0   ;;  %v287_v1 = vmov 2   ;;  %v29_v2 = vld [vmem:[%s316_s0] sm:$0xff]  ;;  %v288_v15 = vmov 1  }
   0x7   :  { %226 = vset.pattern.permute.xlu0 %v286_v0  ;;  %228 = vset.pattern.permute.xlu1 %v287_v1  ;;  %vm212_vm0 = vcmp.lt.s32.totalorder %v29_v2, 0  ;;  %v213_v3 = vceil.f32 %v29_v2  ;;  %v214_v4 = vfloor.f32 %v29_v2  ;;  %v289_v16 = vmov 3   ;;  %v72_v17 = vld [vmem:[#allocation2 + $0x20] sm:$0xff]  ;;  %v70_v21 = vld [vmem:[#allocation2 + $0x10] sm:$0xff]  ;;  %v71_v22 = vld [vmem:[#allocation2 + $0x18] sm:$0xff]  ;;  %s291_s0 = smov [#allocation5]  }
   0x8   :  { %v77_v18 = vpack.c.bf16 %v72_v17, %v72_v17  ;;  %v75_v23 = vpack.c.bf16 %v70_v21, %v70_v21  ;;  %v76_v24 = vpack.c.bf16 %v71_v22, %v71_v22  ;;  %v68_v29 = vld [vmem:[#allocation2] sm:$0xff]  ;;  %v69_v30 = vld [vmem:[#allocation2 + $0x8] sm:$0xff]  ;;  %vm125_vm6 = vcmask 1043456   ;;  %s196_s1 = sshll.u32 %s291_s0, 4  ;;  %s198_s20 = sshll.u32 %s318_s2, 4  ;;  %s197_s1 = int_to_ptr.vmem [resolvable:$true] %s196_s1  ;;  %s199_s20 = int_to_ptr.hbm [resolvable:$true] %s198_s20 }
   0x9   :  { %v215_v5 = vsel %vm212_vm0, %v213_v3, %v214_v4  ;;  %v73_v33 = vpack.c.bf16 %v68_v29, %v68_v29  ;;  %v74_v34 = vpack.c.bf16 %v69_v30, %v69_v30  ;;  %vm121_vm14 = vcmask 326656  }
   0xa   :  { %v216_v6 = vcvt.f32.s32 %v215_v5  ;;  %v82_v19 = vunpack.c.l.bf16 %v77_v18  ;;  %v80_v26 = vunpack.c.l.bf16 %v75_v23  ;;  %v81_v27 = vunpack.c.l.bf16 %v76_v24 }
   0xb   :  { %v151_v36 = vunpack.c.l.b16 %v77_v18  ;;  %v78_v40 = vunpack.c.l.bf16 %v73_v33  ;;  %v79_v41 = vunpack.c.l.bf16 %v74_v34  ;;  %v149_v54 = vunpack.c.l.b16 %v75_v23 }
   0xc   :  { %vm33_vm1 = vcmp.gt.s32.totalorder %v216_v6, 0  ;;  %v87_v20 = vsub.f32 %v72_v17, %v82_v19  ;;  %v85_v31 = vsub.f32 %v70_v21, %v80_v26  ;;  %v86_v32 = vsub.f32 %v71_v22, %v81_v27 }
   0xd   :  { %v34_v7 = vsel %vm33_vm1, %v216_v6, 0  ;;  %v154_v43 = vpack.c.b16 %v151_v36, %v151_v36  ;;  %v83_v47 = vsub.f32 %v68_v29, %v78_v40  ;;  %v84_v48 = vsub.f32 %v69_v30, %v79_v41 }
   0xe   :  { %vm35_vm2 = vcmp.lt.s32.totalorder %v34_v7, 1  ;;  %vm49_vm3 = vcmp.lt.s32.totalorder %v34_v7, 20  ;;  %vm41_vm4 = vcmp.lt.s32.totalorder %v34_v7, 6  ;;  %vm57_vm5 = vcmp.lt.s32.totalorder %v34_v7, 9 }
   0xf   :  { %v36_v8 = vsel %vm35_vm2, %v34_v7, 1  ;;  %v50_v9 = vsel %vm49_vm3, %v34_v7, 20  ;;  %v42_v11 = vsel %vm41_vm4, %v34_v7, 6  ;;  %v58_v12 = vsel %vm57_vm5, %v34_v7, 9 }
  0x10   :  { %38 = vperm.xlu0 %226, %v36_v8   ;;  %v51_v10 = vadd.s32 9, %v50_v9  ;;  %v43_v13 = vadd.s32 2, %v42_v11  ;;  %v59_v14 = vadd.s32 30, %v58_v12  ;;  %v92_v25 = vpack.c.bf16 %v87_v20, %v87_v20 }
  0x11   :  { %v90_v38 = vpack.c.bf16 %v85_v31, %v85_v31  ;;  %v91_v39 = vpack.c.bf16 %v86_v32, %v86_v32  ;;  %v158_v50 = vsel %vm125_vm6, %v154_v43, 0  ;;  %v150_v55 = vunpack.c.l.b16 %v76_v24 }
  0x12   :  { %53 = vperm.xlu1 %228, %v51_v10   ;;  %v97_v28 = vunpack.c.l.bf16 %v92_v25  ;;  %v115_v35 = vunpack.c.l.b16 %v92_v25  ;;  %165 = vmatpush.bf16.msra.mxu1 %v158_v50  ;;  %v88_v58 = vpack.c.bf16 %v83_v47, %v83_v47  ;;  %v89_v59 = vpack.c.bf16 %v84_v48, %v84_v48 }
  0x13   :  { %v95_v45 = vunpack.c.l.bf16 %v90_v38  ;;  %v96_v46 = vunpack.c.l.bf16 %v91_v39  ;;  %v113_v52 = vunpack.c.l.b16 %v90_v38  ;;  %v114_v53 = vunpack.c.l.b16 %v91_v39 }
  0x14   :  { %v102_v37 = vsub.f32 %v87_v20, %v97_v28  ;;  %v118_v42 = vpack.c.b16 %v115_v35, %v115_v35  ;;  %v153_v61 = vpack.c.b16 %v150_v55, %v149_v54  ;;  %v93_v63 = vunpack.c.l.bf16 %v88_v58 }
  0x15   :  { %v100_v56 = vsub.f32 %v85_v31, %v95_v45  ;;  %v101_v57 = vsub.f32 %v86_v32, %v96_v46  ;;  %v117_v60 = vpack.c.b16 %v114_v53, %v113_v52  ;;  %v94_v0 = vunpack.c.l.bf16 %v89_v59 }
  0x16   :  { %v105_v44 = vpack.c.bf16 %v102_v37, %v102_v37  ;;  %v127_v49 = vsel %vm125_vm6, %v118_v42, 0  ;;  %166 = vmatpush.bf16.msra.mxu1 %v153_v61  ;;  %v111_v1 = vunpack.c.l.b16 %v88_v58  ;;  %v112_v2 = vunpack.c.l.b16 %v89_v59 }
  0x17   :  { %134 = vmatpush.bf16.msra.mxu0 %v127_v49  ;;  %v104_v62 = vpack.c.bf16 %v101_v57, %v100_v56  ;;  %v147_v3 = vunpack.c.l.b16 %v73_v33  ;;  %v148_v4 = vunpack.c.l.b16 %v74_v34  ;;  %v98_v5 = vsub.f32 %v83_v47, %v93_v63 }
  0x18   :  { %227 = vset.pattern.permute.xlu0 %v288_v15  ;;  %v174_v51 = vsel %vm125_vm6, %v105_v44, 0  ;;  %v99_v6 = vsub.f32 %v84_v48, %v94_v0  ;;  %v116_v7 = vpack.c.b16 %v112_v2, %v111_v1  ;;  %v31_v11 = vlaneseq }
  0x19   :  { %45 = vperm.xlu0 %227, %v43_v13   ;;  %181 = vmatpush.bf16.msra.mxu2 %v174_v51  ;;  %v152_v8 = vpack.c.b16 %v148_v4, %v147_v3 }
  0x1a   :  { %229 = vset.pattern.permute.xlu1 %v289_v16  ;;  %v103_v9 = vpack.c.bf16 %v99_v6, %v98_v5  ;;  %v32_v13 = vand.u32 127, %v31_v11 }
  0x1b   :  { %61 = vperm.xlu1 %229, %v59_v14   ;;  %135 = vmatpush.bf16.msra.mxu0 %v117_v60 }
  0x1c   :  { %167 = vmatpush.bf16.msra.mxu1 %v152_v8 }
  0x1d   :  { %182 = vmatpush.bf16.msra.mxu2 %v104_v62 }
  0x1f   :  { %136 = vmatpush.bf16.msra.mxu0 %v116_v7 }
  0x21   :  { %230 = vset.pattern.permute.xlu0 %v289_v16  ;;  %183 = vmatpush.bf16.msra.mxu2 %v103_v9  ;;  %v290_v16 = vmov 0.0  }
  0x82   :  { %v39_v10 = vpop.permute.xlu0 %38 }
  0x83   :  { %vm40_vm7 = vcmp.eq.s32.totalorder %v32_v13, %v39_v10 }
  0x84   :  { %v54_v12 = vpop.permute.xlu1 %53 }
  0x85   :  { %vm55_vm9 = vcmp.eq.s32.totalorder %v32_v13, %v54_v12 }
  0x8b   :  { %v46_v14 = vpop.permute.xlu0 %45 }
  0x8c   :  { %vm47_vm8 = vcmp.eq.s32.totalorder %v32_v13, %v46_v14 }
  0x8d   :  { %vm48_vm10 = vmor %vm40_vm7, %vm47_vm8  ;;  %v62_v15 = vpop.permute.xlu1 %61 }
  0x8e   :  { %vm56_vm11 = vmor %vm48_vm10, %vm55_vm9  ;;  %vm63_vm12 = vcmp.eq.s32.totalorder %v32_v13, %v62_v15 }
  0x8f   :  { %vm64_vm13 = vmor %vm56_vm11, %vm63_vm12 }
  0x90   :  { %v208_v17 = vsel %vm64_vm13, 1.0, %v290_v16 }
  0x91   :  { %v67_v18 = vpack.c.bf16 %v208_v17, %v208_v17 }
  0x93   :  { %209 = vmatmul.msk.bf16.vlgmr.msra.gmra.mxu0 %vm121_vm14, %v67_v18  ;;  %210 = vmatmul.msk.bf16.vlgmr.msra.gmra.mxu1 %vm121_vm14, %v67_v18 }
  0x94   :  { %211 = vmatmul.msk.bf16.vlgmr.msra.gmra.mxu2 %vm121_vm14, %v67_v18 }
 0x110   :  { %v138_v19 = vpop.f32.mrf.mxu0  ;;  %v169_v20 = vpop.f32.mrf.mxu1 }
 0x111   :  { %v170_v21 = vadd.f32 %v169_v20, %v138_v19 }
 0x117   :  { %v185_v22 = vpop.f32.mrf.mxu2 }
 0x118   :  { %v189_v23 = vadd.f32 %v185_v22, %v170_v21  ;;  %v140_v24 = vpop.f32.mrf.mxu0  ;;  %v171_v25 = vpop.f32.mrf.mxu1 }
 0x11a   :  { %190 = vst [vmem:[#allocation5] sm:$0xff] %v189_v23 }
 0x11b   :  { %201 = dma.vmem_to_hbm [thread:$0]  %s197_s1, 128, %s199_s20, [#allocation4]  }
 0x11f   :  { %v187_v26 = vpop.f32.mrf.mxu2 }
 0x120   :  { %281 = dma.done.wait [#allocation4], 128  }
 0x121   :  { %282 = vsyncadd [#allocation4], 4294967168 }
 0x122   :  { %206 = vsyncpa [#allocation3], 1 }
 0x123   :  { %207 = vsyncpa [#allocation4], 1 }

</bundles_post_ra>
